<compile_context>
chip_gen: v5e
topology: v5e:2x2
jax: 0.10.0
libtpu: 0.0.40
codegen_flags: <defaults>
</compile_context>

<pallas_src>
import functools

import numpy as np

import jax
import jax.numpy as jnp
from jax.experimental import pallas as pl
from jax.experimental.pallas import tpu as pltpu


def _cdiv(a, b):
    return -(-a // b)


def _round_up(a, m):
    return _cdiv(a, m) * m


def _grad_loss_kernel(x_ref, wt_ref, o_ref, *, square: bool, w: int,
                      rows: int, mask_rows: bool):
    tr, lw = x_ref.shape                              # block shape (static)
    assert tr % 8 == 0

    x = x_ref[...]                                    # (tr, lw) in input dtype
    if mask_rows:
        # Rows past `rows` in the (ragged) last block hold unspecified data;
        # zero them so they contribute exactly nothing (zero diffs).
        row_id = (jax.lax.broadcasted_iota(jnp.int32, (tr, 1), 0)
                  + pl.program_id(0) * tr)
        x = jnp.where(row_id < rows, x, jnp.zeros_like(x))

    # Forward neighbours via lane rotation (rows never mix):
    #   x_w[l] = x[(l+1) mod lw]   (next element along W)
    #   x_h[l] = x[(l+w) mod lw]   (element one H-row ahead)
    # Roll in the input dtype (bf16 packs 2x on the XLU), then cast to f32
    # (matches torch's .float(); roll does not change values).
    x_w = pltpu.roll(x, shift=lw - 1, axis=1)
    x_h = pltpu.roll(x, shift=lw - w, axis=1)
    xf = x.astype(jnp.float32)
    dw = x_w.astype(jnp.float32) - xf
    dh = x_h.astype(jnp.float32) - xf
    if square:
        fw = dw * dw
        fh = dh * dh
    else:
        fw = jnp.abs(dw)
        fh = jnp.abs(dh)

    # Slab-reduce the tr rows down to 8 BEFORE touching the per-lane weights,
    # so the per-element VPU cost stays at diff + f + accumulate.
    s_h = fh.reshape(tr // 8, 8, lw).sum(axis=0)      # (8, lw)
    s_w = fw.reshape(tr // 8, 8, lw).sum(axis=0)      # (8, lw)

    # Per-lane weights fold the H/W boundary masks, both mean denominators and
    # the 0.5 factor (zero weight on wrap-around / padded lanes).
    contrib = s_h * wt_ref[0:1, :] + s_w * wt_ref[1:2, :]

    # 32-byte lane-reduced writeback per grid step, independent of H*W.
    o_ref[...] = jnp.sum(contrib, axis=1, keepdims=True)


def grad_loss(y_pred, y_true=None, *, square: bool = True, reduction: str = "mean",
              _tile_budget_bytes: int = None):
    """Pallas implementation of GradLoss.forward (y_true unused, API parity)."""
    del y_true
    if y_pred.ndim != 4:
        # TODO(synk): the PyTorch module supports arbitrary spatial rank; only
        # NCHW (2 spatial dims) is implemented here.
        raise NotImplementedError("grad_loss kernel supports NCHW (4-D) inputs only")
    if reduction not in ("mean", "sum"):
        # TODO(synk): reduction='none' (per-sample vector) is not implemented.
        raise NotImplementedError(f"reduction={reduction!r} not supported")
    B, C, H, W = map(int, y_pred.shape)
    if H < 2 or W < 2:
        raise ValueError("grad_loss requires H >= 2 and W >= 2")

    rows, hw = B * C, H * W
    itemsize = int(jnp.dtype(y_pred.dtype).itemsize)
    sub = max(8, 32 // itemsize)           # packed sublane multiple (8/16/32)

    # ---- generation-aware tile budget --------------------------------------
    try:
        vmem_cap = int(pltpu.get_tpu_info().vmem_capacity_bytes)
    except Exception:
        vmem_cap = 64 * 1024 * 1024        # conservative fallback
    if vmem_cap <= 64 * 1024 * 1024:       # v7x-class: 64 MiB VMEM per core
        tile_budget = 6 * 1024 * 1024      # f32 tile bytes
        vmem_limit = 48 * 1024 * 1024
    else:                                  # v5e / v6e: 128 MiB VMEM
        tile_budget = 12 * 1024 * 1024
        vmem_limit = 96 * 1024 * 1024
    if _tile_budget_bytes is not None:     # test / tuning override
        tile_budget = int(_tile_budget_bytes)

    # ---- lane-dense 2-D view, minimal padding ------------------------------
    x2 = y_pred.reshape(rows, hw)
    lw = hw if hw % 128 == 0 else _round_up(hw, 128)   # lane block width
    rows_arr = rows if rows >= 8 else 8                 # block must start in-bounds
    if lw != hw or rows_arr != rows:
        # TODO(synk): the lane pad (unaligned H*W) still costs one HBM copy; a
        # fully pad-free path needs in-kernel shifts over a non-128-multiple
        # width.  Zero rows/lanes contribute exactly 0 to the loss.
        x2 = jnp.pad(x2, ((0, rows_arr - rows), (0, lw - hw)))

    # ---- row tiling: big blocks, rebalanced, >=2 steps when possible --------
    tr_max = max(sub, (tile_budget // (lw * 4)) // sub * sub)
    nsteps = _cdiv(rows_arr, tr_max)
    if nsteps == 1 and rows_arr >= 2 * sub:
        nsteps = 2                          # give both v7x cores / pipeline work
    tr = _round_up(_cdiv(rows_arr, nsteps), sub)
    nsteps = _cdiv(rows_arr, tr)            # guarantees (nsteps-1)*tr < rows_arr
    mask_rows = tr * nsteps > rows_arr      # ragged last block -> mask in-kernel
    # TODO(synk): a single sub-row f32 tile larger than the VMEM budget (huge
    # H*W) would need a second, lane-tiled grid axis with cross-tile diffs.

    # ---- per-lane weights (trace-time constants) ---------------------------
    lane = np.arange(lw)
    weights_np = np.zeros((8, lw), dtype=np.float32)
    weights_np[0] = np.where(lane < hw - W, 0.5 / (C * (H - 1) * W), 0.0)
    weights_np[1] = np.where((lane < hw) & (lane % W != W - 1),
                             0.5 / (C * H * (W - 1)), 0.0)
    weights = jnp.asarray(weights_np)       # (8, lw) f32

    kernel = functools.partial(_grad_loss_kernel, square=square, w=W,
                               rows=rows_arr, mask_rows=mask_rows)
    partials = pl.pallas_call(
        kernel,
        out_shape=jax.ShapeDtypeStruct((nsteps * 8, 1), jnp.float32),
        grid_spec=pltpu.PrefetchScalarGridSpec(
            num_scalar_prefetch=0,
            grid=(nsteps,),                 # independent row-tile chunks
            in_specs=[
                pl.BlockSpec((tr, lw), lambda i: (i, 0)),
                pl.BlockSpec((8, lw), lambda i: (0, 0)),   # weights, resident
            ],
            out_specs=pl.BlockSpec((8, 1), lambda i: (i, 0)),
        ),
        compiler_params=pltpu.CompilerParams(
            dimension_semantics=("parallel",),    # each step owns its output block
            vmem_limit_bytes=vmem_limit,
        ),
        cost_estimate=pl.CostEstimate(
            flops=10 * rows_arr * lw,
            transcendentals=0,
            bytes_accessed=rows_arr * lw * itemsize + 8 * lw * 4 + nsteps * 8 * 4,
        ),
    )(x2, weights)

    total = jnp.sum(partials)               # tiny final reduction in XLA
    if reduction == "mean":
        return total / B
    return total                             # 'sum'


def grad_loss_ref(x, *, square: bool = True, reduction: str = "mean"):
    """Pure-JAX reference mirroring the PyTorch module."""
    x = x.astype(jnp.float32)
    dh = x[:, :, 1:, :] - x[:, :, :-1, :]
    dw = x[:, :, :, 1:] - x[:, :, :, :-1]
    if square:
        fh, fw = dh * dh, dw * dw
    else:
        fh, fw = jnp.abs(dh), jnp.abs(dw)
    B = x.shape[0]
    per_b = 0.5 * (jnp.mean(fh.reshape(B, -1), axis=-1)
                   + jnp.mean(fw.reshape(B, -1), axis=-1))
    if reduction == "mean":
        return jnp.mean(per_b)
    if reduction == "sum":
        return jnp.sum(per_b)
    return per_b


if __name__ == "__main__":
    # 1) Module defaults (square=True, reduction='mean'), aligned shape.
    x = jax.random.normal(jax.random.PRNGKey(0), (2, 4, 16, 16), dtype=jnp.float32)
    out = jax.block_until_ready(grad_loss(x, square=True, reduction="mean"))
    ref = grad_loss_ref(x, square=True, reduction="mean")
    assert out.shape == (), f"expected scalar, got {out.shape}"
    assert jnp.allclose(out, ref, rtol=1e-4, atol=1e-6), (out, ref)

    # 2) Unaligned H*W and B*C < 8, abs + sum (exercises the padded fallback).
    x2 = jax.random.normal(jax.random.PRNGKey(1), (2, 3, 7, 9), dtype=jnp.float32)
    out2 = jax.block_until_ready(grad_loss(x2, square=False, reduction="sum"))
    ref2 = grad_loss_ref(x2, square=False, reduction="sum")
    assert jnp.allclose(out2, ref2, rtol=1e-4, atol=1e-6), (out2, ref2)

    # 3) Multi-step grid with a ragged last block (exercises the in-kernel row
    #    mask and the parallel grid path) via a tiny tile-budget override.
    x3 = jax.random.normal(jax.random.PRNGKey(2), (4, 9, 8, 128), dtype=jnp.float32)
    out3 = jax.block_until_ready(grad_loss(x3, _tile_budget_bytes=64 * 1024))
    ref3 = grad_loss_ref(x3)
    assert jnp.allclose(out3, ref3, rtol=1e-4, atol=1e-6), (out3, ref3)

    print("KERNEL_OK")
</pallas_src>

<mosaic_0001>
module attributes {stable_mosaic.version = 11 : i64} {
  func.func @_grad_loss_kernel(%arg0: i32, %arg1: memref<8x256xf32, #tpu.memory_space<vmem>>, %arg2: memref<8x256xf32, #tpu.memory_space<vmem>>, %arg3: memref<8x1xf32, #tpu.memory_space<vmem>>) attributes {dimension_semantics = [#tpu.dimension_semantics<parallel>], iteration_bounds = array<i64: 1>, scalar_prefetch = 0 : i64, scratch_operands = 0 : i64, tpu.core_type = #tpu.core_type<tc>, window_params = [{transform_indices = @transform_0, window_bounds = array<i64: 8, 256>}, {pipeline_mode = #tpu.pipeline_mode<synchronous>, transform_indices = @transform_1, window_bounds = array<i64: 8, 256>}, {transform_indices = @transform_2, window_bounds = array<i64: 8, 1>}]} {
    %c0 = arith.constant 0 : index
    %c0_0 = arith.constant 0 : index
    %0 = vector.load %arg1[%c0, %c0_0] : memref<8x256xf32, #tpu.memory_space<vmem>>, vector<8x256xf32>
    %c255_i32 = arith.constant 255 : i32
    %1 = tpu.dynamic_rotate %0 by %c255_i32 dim 1 : vector<8x256xf32>, i32 -> vector<8x256xf32>
    %c240_i32 = arith.constant 240 : i32
    %2 = tpu.dynamic_rotate %0 by %c240_i32 dim 1 : vector<8x256xf32>, i32 -> vector<8x256xf32>
    %3 = arith.subf %1, %0 : vector<8x256xf32>
    %4 = arith.subf %2, %0 : vector<8x256xf32>
    %5 = arith.mulf %3, %3 : vector<8x256xf32>
    %6 = arith.mulf %4, %4 : vector<8x256xf32>
    %7 = vector.shape_cast %6 : vector<8x256xf32> to vector<1x8x256xf32>
    %cst = arith.constant dense<0.000000e+00> : vector<8x256xf32>
    %8 = vector.multi_reduction <add>, %7, %cst [0] : vector<1x8x256xf32> to vector<8x256xf32>
    %9 = vector.shape_cast %5 : vector<8x256xf32> to vector<1x8x256xf32>
    %cst_1 = arith.constant dense<0.000000e+00> : vector<8x256xf32>
    %10 = vector.multi_reduction <add>, %9, %cst_1 [0] : vector<1x8x256xf32> to vector<8x256xf32>
    %c0_2 = arith.constant 0 : index
    %c0_3 = arith.constant 0 : index
    %11 = vector.load %arg2[%c0_2, %c0_3] : memref<8x256xf32, #tpu.memory_space<vmem>>, vector<1x256xf32>
    %12 = vector.broadcast %11 : vector<1x256xf32> to vector<8x256xf32>
    %13 = arith.mulf %8, %12 : vector<8x256xf32>
    %c1 = arith.constant 1 : index
    %c0_4 = arith.constant 0 : index
    %14 = vector.load %arg2[%c1, %c0_4] : memref<8x256xf32, #tpu.memory_space<vmem>>, vector<1x256xf32>
    %15 = vector.broadcast %14 : vector<1x256xf32> to vector<8x256xf32>
    %16 = arith.mulf %10, %15 : vector<8x256xf32>
    %17 = arith.addf %13, %16 : vector<8x256xf32>
    %cst_5 = arith.constant dense<0.000000e+00> : vector<8xf32>
    %18 = vector.multi_reduction <add>, %17, %cst_5 [1] : vector<8x256xf32> to vector<8xf32>
    %19 = vector.shape_cast %18 : vector<8xf32> to vector<8x1xf32>
    %c0_6 = arith.constant 0 : index
    %c0_7 = arith.constant 0 : index
    %20 = vector.load %arg3[%c0_6, %c0_7] : memref<8x1xf32, #tpu.memory_space<vmem>>, vector<8x1xf32>
    tpu.vector_store %arg3[%c0_6, %c0_7], %19 {strides = array<i32>} : memref<8x1xf32, #tpu.memory_space<vmem>>, vector<8x1xf32>,
    return
  }
  func.func @transform_0(%arg0: i32) -> (i32, i32) {
    %c0_i32 = arith.constant 0 : i32
    %c0_i32_0 = arith.constant 0 : i32
    return %arg0, %c0_i32 : i32, i32
  }
  func.func @transform_1(%arg0: i32) -> (i32, i32) {
    %c0_i32 = arith.constant 0 : i32
    %c0_i32_0 = arith.constant 0 : i32
    %c0_i32_1 = arith.constant 0 : i32
    return %c0_i32, %c0_i32_0 : i32, i32
  }
  func.func @transform_2(%arg0: i32) -> (i32, i32) {
    %c0_i32 = arith.constant 0 : i32
    %c0_i32_0 = arith.constant 0 : i32
    return %arg0, %c0_i32 : i32, i32
  }
}

</mosaic_0001>

<bundles_post_ra>
// kernel: tpu_custom_call.1
= control target key start
LH: loop header
LB: loop body
LE: loop exit
PB: predicated region body
PF: predicated region fallthrough
CT: control target
= control target key end

     0   :  { %7 = vsyncpa [#allocation3], 0  ;;  %s183_s0 = inlined_call_operand.hbm [shape: f32[8,256], index: 0, kind: input, shape index: {}]   ;;  %s184_s1 = inlined_call_operand.hbm [shape: f32[8,256], index: 1, kind: input, shape index: {}]   ;;  %s185_s2 = inlined_call_operand.vmem [shape: f32[8,1], index: 2, kind: output, shape index: {}]  }
   0x1   :  { %s14_s11 = sshll.u32 %s183_s0, 4  ;;  %s15_s11 = int_to_ptr.hbm [resolvable:$true] %s14_s11 }
   0x2   :  { %8 = vsyncpa [#allocation5], 0  ;;  %s155_s12 = smov [#allocation2]   ;;  %s25_s16 = sshll.u32 %s184_s1, 4  ;;  %s26_s16 = int_to_ptr.hbm [resolvable:$true] %s25_s16 }
   0x3   :  { %s16_s13 = sshll.u32 %s155_s12, 4  ;;  %s156_s17 = smov [#allocation4]   ;;  %s17_s13 = int_to_ptr.vmem [resolvable:$true] %s16_s13 }
   0x4   :  { %19 = dma.hbm_to_vmem [thread:$0]  %s15_s11, 256, %s17_s13, [#allocation3]  }
   0x5   :  { %s27_s18 = sshll.u32 %s156_s17, 4  ;;  %s28_s18 = int_to_ptr.vmem [resolvable:$true] %s27_s18 }
   0x6   :  { %30 = dma.hbm_to_vmem [thread:$0]  %s26_s16, 256, %s28_s18, [#allocation5]  }
   0x7   :  { %151 = dma.done.wait [#allocation3], 256  }
   0x8   :  { %152 = vsyncadd [#allocation3], 4294967040 }
   0x9   :  { %153 = dma.done.wait [#allocation5], 256  }
   0xa   :  { %154 = vsyncadd [#allocation5], 4294967040  ;;  %v39_v0 = vld [vmem:[#allocation2] sm:$0xff]  ;;  %s157_s0 = smov 112   ;;  %s158_s19 = smov 127   ;;  %v40_v1 = vld [vmem:[#allocation2 + $0x8] sm:$0xff]  ;;  %v45_v2 = vlaneseq }
   0xb   :  { %50 = vrot.lane.b32.xlu1 %v39_v0, %s157_s0  ;;  %41 = vrot.lane.b32.xlu0 %v39_v0, %s158_s19  ;;  %v69_v6 = vld [vmem:[#allocation4] ss:$8 sm:$0x3]  ;;  %v78_v7 = vld [vmem:[#allocation4 + $0x1] ss:$8 sm:$0x3] }
   0xc   :  { %v46_v5 = vand.u32 127, %v45_v2  ;;  %v71_v10 = vperm.slane %v69_v6, 0  ;;  %v72_v11 = vperm.slane %v69_v6, 1  ;;  %v80_v12 = vperm.slane %v78_v7, 0 }
   0xd   :  { %v81_v13 = vperm.slane %v78_v7, 1  ;;  %vm91_vm2 = vcmask 7168  }
   0xe   :  { %vm54_vm0 = vcmp.lt.s32.totalorder %v46_v5, 112  ;;  %vm47_vm1 = vcmp.lt.s32.totalorder %v46_v5, 127 }
  0x13   :  { %52 = vrot.lane.b32.xlu1 %v40_v1, %s157_s0  ;;  %43 = vrot.lane.b32.xlu0 %v40_v1, %s158_s19 }
  0x7d   :  { %v51_v3 = vpop.permute.xlu1 %50  ;;  %v42_v4 = vpop.permute.xlu0 %41 }
  0x85   :  { %v53_v8 = vpop.permute.xlu1 %52  ;;  %v44_v9 = vpop.permute.xlu0 %43 }
  0x86   :  { %v55_v14 = vsel %vm54_vm0, %v51_v3, %v53_v8  ;;  %v56_v15 = vsel %vm54_vm0, %v53_v8, %v51_v3  ;;  %v48_v16 = vsel %vm47_vm1, %v42_v4, %v44_v9  ;;  %v49_v17 = vsel %vm47_vm1, %v44_v9, %v42_v4 }
  0x87   :  { %v59_v18 = vsub.f32 %v55_v14, %v39_v0  ;;  %v60_v19 = vsub.f32 %v56_v15, %v40_v1  ;;  %v57_v20 = vsub.f32 %v48_v16, %v39_v0  ;;  %v58_v21 = vsub.f32 %v49_v17, %v40_v1 }
  0x89   :  { %v63_v22 = vmul.f32 %v59_v18, %v59_v18  ;;  %v64_v23 = vmul.f32 %v60_v19, %v60_v19  ;;  %v61_v24 = vmul.f32 %v57_v20, %v57_v20  ;;  %v62_v25 = vmul.f32 %v58_v21, %v58_v21 }
  0x8b   :  { %v75_v26 = vmul.f32 %v71_v10, %v63_v22  ;;  %v76_v27 = vmul.f32 %v72_v11, %v64_v23  ;;  %v84_v28 = vmul.f32 %v80_v12, %v61_v24  ;;  %v85_v29 = vmul.f32 %v81_v13, %v62_v25 }
  0x8d   :  { %v86_v30 = vadd.f32 %v84_v28, %v75_v26  ;;  %v87_v31 = vadd.f32 %v85_v29, %v76_v27 }
  0x8f   :  { %v88_v32 = vadd.f32 %v87_v31, %v86_v30 }
  0x91   :  { %89 = vadd.xlane.f32.xlu2 %v88_v32 }
 0x104   :  { %v90_v33 = vpop.xlane.xlu2 %89 }
 0x105   :  { %92 = vst.msk [vmem:[%s185_s2] sm:$0xff] %vm91_vm2, %v90_v33 }
 0x106   :  { %97 = vsyncpa [#allocation3], 1 }
 0x107   :  { %98 = vsyncpa [#allocation5], 1 }

</bundles_post_ra>
